<compile_context>
chip_gen: v5e
topology: v5e:2x2
jax: 0.10.0
libtpu: 0.0.40
codegen_flags: <defaults>
</compile_context>

<pallas_src>
import functools

import jax
import jax.numpy as jnp
from jax import lax
from jax.experimental import pallas as pl
from jax.experimental.pallas import tpu as pltpu

_MiB = 1024 * 1024


# ---------------------------------------------------------------------------
# VMEM accounting helpers (lane-padding aware, per review item 4)
# ---------------------------------------------------------------------------
def _round_up(n, m):
    return -(-int(n) // int(m)) * int(m)


def _sublane_multiple(dtype):
    itemsize = jnp.dtype(dtype).itemsize
    return 8 * max(1, 4 // itemsize)          # 8 for f32, 16 for bf16, 32 for int8


def _vmem_block_bytes(block_shape, dtype):
    """Physical VMEM bytes of a resident block: last dim padded to 128 lanes, second-to-last
    padded to the dtype's sublane multiple, leading dims multiply."""
    itemsize = jnp.dtype(dtype).itemsize
    dims = [int(d) for d in block_shape]
    if len(dims) == 1:
        dims = [1] + dims
    lead = 1
    for d in dims[:-2]:
        lead *= d
    sub = _round_up(dims[-2], _sublane_multiple(dtype))
    lane = _round_up(dims[-1], 128)
    return lead * sub * lane * itemsize


def _vmem_limit_bytes():
    """Generation-aware scoped-VMEM limit: ~96 MiB on 128 MiB parts (v5e/v6e), ~48 MiB on
    v7x's 64 MiB VMEM.  Falls back conservatively if the query is unavailable."""
    cap = 64 * _MiB
    try:
        info = pltpu.get_tpu_info()
        cap = int(getattr(info, "vmem_capacity_bytes", cap))
    except Exception:
        pass
    limit = min(cap - 8 * _MiB, int(cap * 0.75))
    return int(max(32 * _MiB, limit))


_VMEM_LIMIT = _vmem_limit_bytes()
_BLOCK_BUDGET = int(_VMEM_LIMIT * 0.7)        # per-grid-step resident budget (blocks + temps)


# ---------------------------------------------------------------------------
# Shared in-kernel pieces
# ---------------------------------------------------------------------------
def _reorder_hw_to_wh(y, h, w):
    """(C_out, h*w) with columns in (h, w)-major order -> (C_out, w*h) in (w, h)-major order.
    Single in-VMEM minor-dim reorder (reshape / swapaxes / reshape); this is the PyTorch
    .transpose(1, 3) fused into the kernel, so it never touches HBM."""
    c_out = y.shape[0]
    return jnp.swapaxes(y.reshape(c_out, h, w), 1, 2).reshape(c_out, w * h)


def _project_core(xb, wmat):
    """(H, Wb, C_in) raw-view block + (C_out, C_in) weight -> (C_out, Wb*H) f32 tile,
    columns in (w, h)-major order (== out[b, :, w, h] flattened).  One MXU dot_general."""
    h, wb, c_in = xb.shape
    a = xb.reshape(h * wb, c_in)                              # view rows, (h, w)-major
    if wmat.dtype != a.dtype:
        wmat = wmat.astype(a.dtype)
    y = lax.dot_general(wmat, a, (((1,), (1,)), ((), ())),
                        preferred_element_type=jnp.float32)   # (C_out, H*Wb), single matmul
    return _reorder_hw_to_wh(y, h, wb)


# ---------------------------------------------------------------------------
# Kernels
# ---------------------------------------------------------------------------
def _fused_kernel(x_ref, w_ref, o_ref):
    """Path A: fully fused centering + projection + output permutation, one batch per step.
       x_ref: (1, H, W, C_in) raw reinterpret of the NCHW bytes
       o_ref: (1, C_out, W*H)  lane-dense slice of the flattened (B, C_out, W, H) output."""
    xb = x_ref[0]                                             # (H, W, C_in)
    h, w, c_in = xb.shape
    hw = h * w
    p = hw // c_in                                            # view rows per original channel
    # Segmented per-channel mean on the raw view (valid because H*W % C_in == 0 on this path):
    # regroup (H*W, C_in) -> (C_in, P, C_in); axis 0 is the original channel.  f32 accumulation.
    v = xb.reshape(c_in, p, c_in)
    v32 = v.astype(jnp.float32)
    ch_sum = jnp.sum(jnp.sum(v32, axis=2, keepdims=True), axis=1, keepdims=True)  # (C_in,1,1)
    ch_mean = ch_sum * (1.0 / hw)
    centered = (v - ch_mean.astype(v.dtype)).reshape(h, w, c_in)
    y = _project_core(centered, w_ref[...])                   # (C_out, W*H)
    o_ref[0] = y.astype(o_ref.dtype)


def _project_kernel(x_ref, w_ref, o_ref):
    """Projection only (input already centered).  x_ref: (1, H, Wb, C_in)."""
    y = _project_core(x_ref[0], w_ref[...])
    o_ref[0] = y.astype(o_ref.dtype)


def _project_rank1_kernel(x_ref, w_ref, m_ref, o_ref):
    """Path B: projection with centering folded in post-matmul as a rank-1 correction:
         (x - m) @ W^T == x @ W^T - m * rowsum(W)
       m_ref: (1, 1, Wb*H) per-view-row channel means, already in (w, h)-major band order."""
    wmat = w_ref[...]
    y = _project_core(x_ref[0], wmat)                         # (C_out, Wb*H), f32
    wsum = jnp.sum(wmat.astype(jnp.float32), axis=1, keepdims=True)   # (C_out, 1)
    y = y - wsum * m_ref[0]                                   # (C_out,1)*(1,Wb*H) broadcast
    o_ref[0] = y.astype(o_ref.dtype)


def _row_sum_kernel(x_ref, o_ref):
    """Per-row f32 partial sums, accumulated across the (last, 'arbitrary') column-tile axis.
    NOTE: when the row tile does not divide the row count, the padded rows read undefined
    data, but the reduction is per-row only and those output rows are discarded."""
    j = pl.program_id(1)

    @pl.when(j == 0)
    def _():
        o_ref[...] = jnp.zeros_like(o_ref)

    o_ref[...] += jnp.sum(x_ref[...].astype(jnp.float32), axis=1, keepdims=True)


def _center_kernel(x_ref, o_ref):
    """Path C centering: per-row mean subtract over full (lane-dense) rows.
    Padded rows (when the row tile does not divide the row count) read undefined data but
    their results are discarded; the reduction is per-row only."""
    x = x_ref[...]
    mean = jnp.sum(x.astype(jnp.float32), axis=1, keepdims=True) * (1.0 / x.shape[1])
    o_ref[...] = (x - mean.astype(x.dtype))


# ---------------------------------------------------------------------------
# pallas_call wrappers
# ---------------------------------------------------------------------------
def _fused(a4, weight, out_dtype):
    B, H, W, C_in = a4.shape
    C_out = weight.shape[0]
    return pl.pallas_call(
        _fused_kernel,
        out_shape=jax.ShapeDtypeStruct((B, C_out, W * H), out_dtype),
        grid=(B,),
        in_specs=[pl.BlockSpec((1, H, W, C_in), lambda b: (b, 0, 0, 0)),
                  pl.BlockSpec((C_out, C_in), lambda b: (0, 0))],
        out_specs=pl.BlockSpec((1, C_out, W * H), lambda b: (b, 0, 0)),
        compiler_params=pltpu.CompilerParams(
            dimension_semantics=("parallel",),
            vmem_limit_bytes=_VMEM_LIMIT),
    )(a4, weight)


def _project(a4, weight, out_dtype, *, w_block, m_exp=None):
    """a4: (B, H, W, C_in) raw reinterpret view; returns lane-dense (B, C_out, W*H)."""
    B, H, W, C_in = a4.shape
    C_out = weight.shape[0]
    grid = (B, W // w_block)
    x_spec = pl.BlockSpec((1, H, w_block, C_in), lambda b, wt: (b, 0, wt, 0))
    w_spec = pl.BlockSpec((C_out, C_in), lambda b, wt: (0, 0))
    out_spec = pl.BlockSpec((1, C_out, w_block * H), lambda b, wt: (b, 0, wt))
    out_shape = jax.ShapeDtypeStruct((B, C_out, W * H), out_dtype)
    params = pltpu.CompilerParams(
        dimension_semantics=("parallel", "parallel"),
        vmem_limit_bytes=_VMEM_LIMIT)
    if m_exp is None:
        return pl.pallas_call(
            _project_kernel, out_shape=out_shape, grid=grid,
            in_specs=[x_spec, w_spec], out_specs=out_spec,
            compiler_params=params)(a4, weight)
    m_spec = pl.BlockSpec((1, 1, w_block * H), lambda b, wt: (b, 0, wt))
    return pl.pallas_call(
        _project_rank1_kernel, out_shape=out_shape, grid=grid,
        in_specs=[x_spec, w_spec, m_spec], out_specs=out_spec,
        compiler_params=params)(a4, weight, m_exp)


def _row_means(x2, *, block_budget):
    """Per-row means of a (rows, cols) array, f32, with lane-dense column tiles and
    accumulation across the column-tile (reduction-last, 'arbitrary') grid axis."""
    rows, cols = x2.shape
    itemsize = jnp.dtype(x2.dtype).itemsize
    # Column tile: full width if an 8-row strip fits, else the largest 128-multiple divisor.
    cb = cols
    if 8 * cols * itemsize > block_budget:
        for d in range(cols // 128, 0, -1):
            c = d * 128
            if cols % c == 0 and 8 * c * itemsize <= block_budget:
                cb = c
                break
    # Row tile: multiple of 8 sized to the budget (in/out double-buffered + f32 temps ~6x raw).
    rb = max(1, block_budget // max(6 * cb * itemsize, 1))
    rb = (rb // 8) * 8
    if rb < 8 or rb >= rows:
        rb = rows
    grid = (pl.cdiv(rows, rb), cols // cb)
    sums = pl.pallas_call(
        _row_sum_kernel,
        out_shape=jax.ShapeDtypeStruct((rows, 1), jnp.float32),
        grid=grid,
        in_specs=[pl.BlockSpec((rb, cb), lambda i, j: (i, j))],
        out_specs=pl.BlockSpec((rb, 1), lambda i, j: (i, 0)),
        compiler_params=pltpu.CompilerParams(
            dimension_semantics=("parallel", "arbitrary"),
            vmem_limit_bytes=_VMEM_LIMIT),
    )(x2)
    return sums * (1.0 / cols)


def _center(x2, *, block_budget):
    """Row-tiled centering (Path C only): rows = (b, c) pairs, cols = H*W (lane-dense)."""
    rows, cols = x2.shape
    itemsize = jnp.dtype(x2.dtype).itemsize
    rb = max(1, block_budget // max(6 * cols * itemsize, 1))
    rb = (rb // 8) * 8
    if rb < 8 or rb >= rows:
        rb = rows
    return pl.pallas_call(
        _center_kernel,
        out_shape=jax.ShapeDtypeStruct((rows, cols), x2.dtype),
        grid=(pl.cdiv(rows, rb),),
        in_specs=[pl.BlockSpec((rb, cols), lambda i: (i, 0))],
        out_specs=pl.BlockSpec((rb, cols), lambda i: (i, 0)),
        compiler_params=pltpu.CompilerParams(
            dimension_semantics=("parallel",),
            vmem_limit_bytes=_VMEM_LIMIT),
    )(x2)


# ---------------------------------------------------------------------------
# Block-size selection (lane-padding aware)
# ---------------------------------------------------------------------------
def _fused_step_bytes(H, W, C_in, C_out, dtype):
    b = 2 * _vmem_block_bytes((1, H, W, C_in), dtype)            # input block (double-buffered)
    b += 2 * _vmem_block_bytes((1, C_out, W * H), dtype)         # output block
    b += 2 * _vmem_block_bytes((C_out, C_in), dtype)             # weight
    b += 2 * _vmem_block_bytes((H * W, C_in), jnp.float32)       # segmented view + centered copy
    b += 2 * _vmem_block_bytes((C_out, H * W), jnp.float32)      # matmul result + reorder copy
    b += _vmem_block_bytes((C_out, H, W), jnp.float32)           # reorder intermediates
    b += _vmem_block_bytes((C_out, W, H), jnp.float32)
    return b


def _project_step_bytes(H, w_block, C_in, C_out, dtype, with_m):
    b = 2 * _vmem_block_bytes((1, H, w_block, C_in), dtype)
    b += 2 * _vmem_block_bytes((1, C_out, w_block * H), dtype)
    b += 2 * _vmem_block_bytes((C_out, C_in), dtype)
    if with_m:
        b += 2 * _vmem_block_bytes((1, 1, w_block * H), jnp.float32)
    b += _vmem_block_bytes((H * w_block, C_in), jnp.float32)      # flattened view
    b += 2 * _vmem_block_bytes((C_out, H * w_block), jnp.float32)  # matmul result + final
    b += _vmem_block_bytes((C_out, H, w_block), jnp.float32)      # reorder intermediates
    b += _vmem_block_bytes((C_out, w_block, H), jnp.float32)
    return b


def _choose_w_block(H, W, C_in, C_out, dtype, *, with_m, budget, max_w_block=None):
    # Legal w-bands: W itself (full-extent block), or divisors of W that are multiples of 8
    # (sublane rule on the input block) AND give a 128-multiple lane-dense output band.
    cands = [W] + [d for d in range(W - 1, 0, -1)
                   if W % d == 0 and d % 8 == 0 and (d * H) % 128 == 0]
    if max_w_block is not None:
        filt = [d for d in cands if d <= max_w_block]
        cands = filt or [cands[-1]]
    for wb in cands:
        if _project_step_bytes(H, wb, C_in, C_out, dtype, with_m) <= budget:
            return wb
    # Best effort: nothing fits the (conservative) budget — take the smallest legal band and
    # rely on the generous vmem_limit.  (Guarded estimate, per review.)
    return cands[-1]


# ---------------------------------------------------------------------------
# Module forward
# ---------------------------------------------------------------------------
def orthogonal_linear_forward(x, weight, *, force_tiled=False, max_w_block=None):
    """Pallas forward of OrthogonalLinear.

    x: (B, C_in, H, W); weight: (C_out, C_in).  Returns (B, C_out, W, H), exactly matching the
    PyTorch module's `.view(B*H*W, C_in) @ W.T -> .view(B, H, W, C_out).transpose(1, 3)`.
    """
    B, C_in, H, W = x.shape
    C_out = weight.shape[0]
    HW = H * W
    out_dtype = x.dtype
    itemsize = jnp.dtype(x.dtype).itemsize

    a4 = x.reshape(B, H, W, C_in)          # free reinterpret == torch .view on the NCHW bytes
    segmented = (HW % C_in == 0)           # rows of the raw view never straddle channels

    # Path A: fully fused (centering + projection + permutation), ~1.3 HBM passes.
    if (segmented and not force_tiled
            and _fused_step_bytes(H, W, C_in, C_out, x.dtype) <= _BLOCK_BUDGET):
        y_flat = _fused(a4, weight, out_dtype)
        return y_flat.reshape(B, C_out, W, H)

    if segmented:
        # Path B: per-(b, c) means pre-pass, then a w-band-tiled projection (grid (B, W//wb),
        # both axes "parallel") that applies centering as a post-matmul rank-1 correction.
        # No centered copy of x is ever written to HBM (~2.3 passes instead of ~3.5).
        means = _row_means(x.reshape(B * C_in, HW), block_budget=_BLOCK_BUDGET)
        means = means.reshape(B, C_in)
        P = HW // C_in
        # Expand to per-view-row means in (w, h)-major band order: tiny XLA op (B*H*W floats).
        ch_idx = (jnp.arange(H)[None, :] * W + jnp.arange(W)[:, None]) // P     # (W, H)
        m_exp = jnp.take(means, ch_idx.reshape(-1), axis=1).reshape(B, 1, W * H)
        wb = _choose_w_block(H, W, C_in, C_out, x.dtype, with_m=True,
                             budget=_BLOCK_BUDGET, max_w_block=max_w_block)
        y_flat = _project(a4, weight, out_dtype, w_block=wb, m_exp=m_exp)
        return y_flat.reshape(B, C_out, W, H)

    # Path C (rare: H*W not a multiple of C_in): materialize the centered tensor once with a
    # row-tiled lane-dense kernel, then run the same tiled projection without the correction.
    x2 = x.reshape(B * C_in, HW)
    if 6 * 8 * HW * itemsize <= _BLOCK_BUDGET:
        z2 = _center(x2, block_budget=_BLOCK_BUDGET)
    else:
        # TODO(synk): irregular (H*W % C_in != 0) AND very large H*W — centering left to XLA.
        z2 = (x - jnp.mean(x, axis=(2, 3), keepdims=True)).reshape(B * C_in, HW)
    z4 = z2.reshape(B, H, W, C_in)
    wb = _choose_w_block(H, W, C_in, C_out, x.dtype, with_m=False,
                         budget=_BLOCK_BUDGET, max_w_block=max_w_block)
    y_flat = _project(z4, weight, out_dtype, w_block=wb, m_exp=None)
    return y_flat.reshape(B, C_out, W, H)


# ---------------------------------------------------------------------------
# Setup + reference
# ---------------------------------------------------------------------------
def make_orthogonal_weight(key, out_channels, in_channels):
    """Deterministic analogue of nn.init.orthogonal_ for out <= in (orthonormal rows)."""
    a = jax.random.normal(key, (in_channels, out_channels), dtype=jnp.float32)
    q, r = jnp.linalg.qr(a)                     # (in, out), orthonormal cols
    q = q * jnp.sign(jnp.diagonal(r))[None, :]
    return q.T                                  # (out, in), orthonormal rows


def reference_forward(x, weight):
    B, C_in, H, W = x.shape
    z = x - jnp.mean(x, axis=(2, 3), keepdims=True)
    a = z.reshape(B * H * W, C_in)
    y = (a @ weight.T).reshape(B, H, W, -1)
    return jnp.transpose(y, (0, 3, 2, 1))


if __name__ == "__main__":
    key = jax.random.PRNGKey(0)
    kx, kw, kx2 = jax.random.split(key, 3)

    B, C_in, C_out, H, W = 2, 8, 4, 16, 16
    weight = make_orthogonal_weight(kw, C_out, C_in)
    x = jax.random.normal(kx, (B, C_in, H, W), dtype=jnp.float32)
    y_ref = reference_forward(x, weight)

    # Path A: fully fused (centering + projection + permutation), grid (B,).
    y_a = jax.block_until_ready(orthogonal_linear_forward(x, weight))
    assert y_a.shape == (B, C_out, W, H)
    assert jnp.allclose(y_a, y_ref, atol=3e-5, rtol=3e-5), "fused path mismatch"

    # Path B: means pre-pass + w-band-tiled projection with rank-1 centering (the path large
    # feature maps take on v7x); forced at a small shape here to exercise the tiled grid.
    y_b = jax.block_until_ready(
        orthogonal_linear_forward(x, weight, force_tiled=True, max_w_block=8))
    assert y_b.shape == (B, C_out, W, H)
    assert jnp.allclose(y_b, y_ref, atol=3e-5, rtol=3e-5), "tiled path mismatch"

    # Path C: H*W not a multiple of C_in -> centered copy + tiled projection.
    H2 = W2 = 6
    x2 = jax.random.normal(kx2, (B, C_in, H2, W2), dtype=jnp.float32)
    y_c = jax.block_until_ready(orthogonal_linear_forward(x2, weight))
    y2_ref = reference_forward(x2, weight)
    assert y_c.shape == (B, C_out, W2, H2)
    assert jnp.allclose(y_c, y2_ref, atol=3e-5, rtol=3e-5), "fallback path mismatch"

    print("KERNEL_OK")
</pallas_src>

<mosaic_0001>
module attributes {stable_mosaic.version = 11 : i64} {
  func.func @_fused_kernel(%arg0: i32, %arg1: memref<1x16x16x8xf32, #tpu.memory_space<vmem>>, %arg2: memref<4x8xf32, #tpu.memory_space<vmem>>, %arg3: memref<1x4x256xf32, #tpu.memory_space<vmem>>) attributes {dimension_semantics = [#tpu.dimension_semantics<parallel>], iteration_bounds = array<i64: 2>, scalar_prefetch = 0 : i64, scratch_operands = 0 : i64, tpu.core_type = #tpu.core_type<tc>, window_params = [{transform_indices = @transform_0, window_bounds = array<i64: 1, 16, 16, 8>}, {pipeline_mode = #tpu.pipeline_mode<synchronous>, transform_indices = @transform_1, window_bounds = array<i64: 4, 8>}, {transform_indices = @transform_2, window_bounds = array<i64: 1, 4, 256>}]} {
    %c0 = arith.constant 0 : index
    %c0_0 = arith.constant 0 : index
    %c0_1 = arith.constant 0 : index
    %c0_2 = arith.constant 0 : index
    %0 = vector.load %arg1[%c0, %c0_0, %c0_1, %c0_2] : memref<1x16x16x8xf32, #tpu.memory_space<vmem>>, vector<1x16x16x8xf32>
    %1 = vector.shape_cast %0 : vector<1x16x16x8xf32> to vector<16x16x8xf32>
    %2 = vector.shape_cast %1 : vector<16x16x8xf32> to vector<8x32x8xf32>
    %cst = arith.constant dense<0.000000e+00> : vector<8x32xf32>
    %3 = vector.multi_reduction <add>, %2, %cst [2] : vector<8x32x8xf32> to vector<8x32xf32>
    %4 = vector.shape_cast %3 : vector<8x32xf32> to vector<8x32x1xf32>
    %cst_3 = arith.constant dense<0.000000e+00> : vector<8x1xf32>
    %5 = vector.multi_reduction <add>, %4, %cst_3 [1] : vector<8x32x1xf32> to vector<8x1xf32>
    %6 = vector.shape_cast %5 : vector<8x1xf32> to vector<8x1x1xf32>
    %cst_4 = arith.constant 3.906250e-03 : f32
    %7 = vector.broadcast %cst_4 : f32 to vector<8x1x1xf32>
    %8 = arith.mulf %6, %7 : vector<8x1x1xf32>
    %9 = vector.broadcast %8 : vector<8x1x1xf32> to vector<8x32x8xf32>
    %10 = arith.subf %2, %9 : vector<8x32x8xf32>
    %11 = vector.shape_cast %10 : vector<8x32x8xf32> to vector<16x16x8xf32>
    %c0_5 = arith.constant 0 : index
    %c0_6 = arith.constant 0 : index
    %12 = vector.load %arg2[%c0_5, %c0_6] : memref<4x8xf32, #tpu.memory_space<vmem>>, vector<4x8xf32>
    %13 = vector.shape_cast %11 : vector<16x16x8xf32> to vector<256x8xf32>
    %cst_7 = arith.constant dense<0.000000e+00> : vector<4x256xf32>
    %14 = tpu.matmul %12, %13, %cst_7 {dimension_numbers = #tpu.dot_dimension_numbers<[1], [1], [0], [0], [0, 0, 1, 0], [], []>} : vector<4x8xf32>, vector<256x8xf32>, vector<4x256xf32> -> vector<4x256xf32>
    %15 = vector.shape_cast %14 : vector<4x256xf32> to vector<4x16x16xf32>
    %16 = tpu.transpose %15, [0, 2, 1] : vector<4x16x16xf32> -> vector<4x16x16xf32>
    %17 = vector.shape_cast %16 : vector<4x16x16xf32> to vector<4x256xf32>
    %c0_8 = arith.constant 0 : index
    %c0_9 = arith.constant 0 : index
    %c0_10 = arith.constant 0 : index
    %18 = vector.load %arg3[%c0_8, %c0_9, %c0_10] : memref<1x4x256xf32, #tpu.memory_space<vmem>>, vector<1x4x256xf32>
    %19 = vector.shape_cast %18 : vector<1x4x256xf32> to vector<4x256xf32>
    %20 = vector.shape_cast %17 : vector<4x256xf32> to vector<1x4x256xf32>
    tpu.vector_store %arg3[%c0_8, %c0_9, %c0_10], %20 {strides = array<i32>} : memref<1x4x256xf32, #tpu.memory_space<vmem>>, vector<1x4x256xf32>,
    return
  }
  func.func @transform_0(%arg0: i32) -> (i32, i32, i32, i32) {
    %c0_i32 = arith.constant 0 : i32
    %c0_i32_0 = arith.constant 0 : i32
    %c0_i32_1 = arith.constant 0 : i32
    %c0_i32_2 = arith.constant 0 : i32
    return %arg0, %c0_i32, %c0_i32_0, %c0_i32_1 : i32, i32, i32, i32
  }
  func.func @transform_1(%arg0: i32) -> (i32, i32) {
    %c0_i32 = arith.constant 0 : i32
    %c0_i32_0 = arith.constant 0 : i32
    %c0_i32_1 = arith.constant 0 : i32
    return %c0_i32, %c0_i32_0 : i32, i32
  }
  func.func @transform_2(%arg0: i32) -> (i32, i32, i32) {
    %c0_i32 = arith.constant 0 : i32
    %c0_i32_0 = arith.constant 0 : i32
    %c0_i32_1 = arith.constant 0 : i32
    return %arg0, %c0_i32, %c0_i32_0 : i32, i32, i32
  }
}

</mosaic_0001>

<bundles_post_ra>
// kernel: tpu_custom_call.1
= control target key start
LH: loop header
LB: loop body
LE: loop exit
PB: predicated region body
PF: predicated region fallthrough
CT: control target
= control target key end

     0   :  { %7 = vsyncpa [#allocation3], 0  ;;  %s1701_s0 = inlined_call_operand.vmem [shape: f32[2,16,16,8], index: 0, kind: input, shape index: {}]   ;;  %s1702_s1 = inlined_call_operand.vmem [shape: f32[4,8], index: 1, kind: input, shape index: {}]   ;;  %s1703_s2 = inlined_call_operand.hbm [shape: f32[2,4,256], index: 2, kind: output, shape index: {}]  }
   0x1   :  { %9 = vsyncpa [#allocation3 + $0x1], 0  ;;  %s1265_s9 = smov 0   ;;  %s1267_s10 = smov 0  }
   0x2   :  { %s1269_s11 = smov 0   ;;  %s1271_s12 = smov 0  }
   0x3 LB: > { %s1286_s13 = sadd.s32 4294967295, %s1239_s12   ;;  %s1080_s14 = sadd.s32 4294967294, %s1239_s12   ;;  %s1239_s12 = sphi %s1271_s12, %s1709_s12   ;;  %s1235_s11 = sphi %s1269_s11, %s1708_s11   ;;  %s1231_s10 = sphi %s1267_s10, %s1707_s10   ;;  %s1227_s9 = sphi %s1265_s9, %s1706_s9  }
   0x4   : > { %s1290_s15 = sadd.s32 1, %s1239_s12   ;;  %s69_s16 = sadd.s32 1, %s1235_s11 }
   0x5   : > { %s66_s17 = ssub.s32 %s1239_s12, %s1290_s15  ;;  %p79_p0 = scmp.ne.s32.totalorder %s1235_s11, %s1231_s10 }
   0x6   : > { %p67_p1 = scmp.eq.s32.totalorder %s66_s17, 0  ;;  %p80_p2 = scmp.eq.s32.totalorder %s1286_s13, 1 }
   0x7   : > { %p85_p3 = scmp.ne.s32.totalorder %s1231_s10, %s1227_s9  ;;  %p86_p4 = scmp.eq.s32.totalorder %s1080_s14, 1 }
   0x8   : > { %s1301_s18 = scalar_select %p67_p1, %s1235_s11, %s69_s16  }
   0x9   : > { %p1303_p5 = por %p80_p2, %p79_p0  ;;  %p1307_p6 = por %p86_p4, %p85_p3 }
   0xa   : > { %p1083_p7 = scmp.ge.s32.totalorder %s1239_s12, 1  ;;  %p115_p8 = scmp.lt.s32.totalorder %s1239_s12, 3 }
   0xc   : > { %p116_p9 = pnand %p1083_p7, %p115_p8 }
   0xd   : > { %p137_p10 = scmp.lt.s32.totalorder (!%p116_p9), %s1286_s13, 1  ;;  %s1241_s28 = smov (!%p116_p9), 80  }
   0xe   : > { %119 = sbr.rel (%p116_p9) target bundleno = 864 (0x360), region = 28  ;;  %s1242_s29 = smov (!%p116_p9), 96  }
   0xf   : > { %s1243_s30 = smov (!%p116_p9), 112   ;;  %s1244_s3 = smov (!%p116_p9), 48  }
  0x10   : > { %s1245_s4 = smov (!%p116_p9), 64   ;;  %s1246_s5 = smov (!%p116_p9), 16  }
  0x11   : > { %s1247_s6 = smov (!%p116_p9), 32   ;;  %s134_s7 = sand.u32 (!%p116_p9), 1, %s1231_s10  }
  0x12   : > { %s1084_s8 = sshll.u32 (!%p116_p9), %s134_s7, 3  ;;  %s1127_s14 = sshll.u32 (!%p116_p9), %s1286_s13, 3 }
  0x13   : > { %s138_s21 = scalar_select %p137_p10, %s1286_s13, 1  ;;  %vm174_vm0 = vcmask 64512   ;;  %vm568_vm1 = vcmask 1047556   ;;  %vm976_vm2 = vcmask 130048   ;;  %vm978_vm3 = vcmask 261120  }
  0x14   : > { %vm980_vm4 = vcmask 392192   ;;  %vm982_vm5 = vcmask 523264   ;;  %vm984_vm6 = vcmask 654336   ;;  %vm986_vm7 = vcmask 785408   ;;  %s1005_s24 = scalar_lea.sflag [#allocation3], %s134_s7 }
  0x15   : > { %s1126_s22 = sshll.u32 %s138_s21, 8  ;;  %s1016_s21 = scalar_lea.hbm %s1703_s2, %s1127_s14  ;;  %vm988_vm8 = vcmask 916480   ;;  %vm1000_vm9 = vcmask 1043456  }
  0x16   : > { %s1318_s25 = scalar_lea.vmem %s1701_s0, %s1126_s22  ;;  %s136_s22 = scalar_lea.vmem [#allocation2], %s1084_s8 }
  0x17   : > { %v1321_v0 = vld [vmem:[%s1318_s25 + $0xe8] sm:$0xff]  ;;  %v1324_v1 = vld [vmem:[%s1318_s25 + $0x70] sm:$0xff]  ;;  %v1327_v2 = vld [vmem:[%s1318_s25 + $0x60] sm:$0xff]  ;;  %s1018_s23 = sshll.u32 %s136_s22, 4  ;;  %s1020_s13 = sshll.u32 %s1016_s21, 4  ;;  %s1019_s23 = int_to_ptr.vmem [resolvable:$true] %s1018_s23  ;;  %s1021_s13 = int_to_ptr.hbm [resolvable:$true] %s1020_s13 }
  0x18   : > { %v262_v3 = vsel %vm174_vm0, %v1321_v0, 0.0  ;;  %v217_v4 = vsel %vm174_vm0, %v1324_v1, 0.0  ;;  %v211_v5 = vsel %vm174_vm0, %v1327_v2, 0.0  ;;  %v1336_v6 = vld [vmem:[%s1318_s25 + $0x78] sm:$0xff]  ;;  %v1339_v7 = vld [vmem:[%s1318_s25 + $0xe0] sm:$0xff]  ;;  %v1342_v8 = vld [vmem:[%s1318_s25 + $0x68] sm:$0xff] }
  0x19   : > { %263 = vadd.xlane.f32.xlu2 %v262_v3  ;;  %218 = vadd.xlane.f32.xlu1 %v217_v4  ;;  %v220_v9 = vsel %vm174_vm0, %v1336_v6, 0.0  ;;  %v259_v10 = vsel %vm174_vm0, %v1339_v7, 0.0  ;;  %v214_v11 = vsel %vm174_vm0, %v1342_v8, 0.0  ;;  %v1351_v12 = vld [vmem:[%s1318_s25 + $0xf8] sm:$0xff]  ;;  %v1354_v13 = vld [vmem:[%s1318_s25 + $0x40] sm:$0xff]  ;;  %v1357_v14 = vld [vmem:[%s1318_s25 + $0xf0] sm:$0xff] }
  0x1a   : > { %212 = vadd.xlane.f32.xlu0 %v211_v5  ;;  %v268_v15 = vsel %vm174_vm0, %v1351_v12, 0.0  ;;  %v199_v16 = vsel %vm174_vm0, %v1354_v13, 0.0  ;;  %v265_v17 = vsel %vm174_vm0, %v1357_v14, 0.0  ;;  %v1366_v18 = vld [vmem:[%s1318_s25 + $0x50] sm:$0xff]  ;;  %v1369_v19 = vld [vmem:[%s1318_s25 + $0xc0] sm:$0xff]  ;;  %v1372_v20 = vld [vmem:[%s1318_s25 + $0x48] sm:$0xff] }
  0x1b   : > { %v205_v21 = vsel %vm174_vm0, %v1366_v18, 0.0  ;;  %v247_v22 = vsel %vm174_vm0, %v1369_v19, 0.0  ;;  %v202_v23 = vsel %vm174_vm0, %v1372_v20, 0.0  ;;  %v1381_v24 = vld [vmem:[%s1318_s25 + $0x58] sm:$0xff]  ;;  %v1384_v25 = vld [vmem:[%s1318_s25 + $0xd0] sm:$0xff]  ;;  %v1387_v26 = vld [vmem:[%s1318_s25 + $0xc8] sm:$0xff] }
  0x1c   : > { %v208_v27 = vsel %vm174_vm0, %v1381_v24, 0.0  ;;  %v253_v28 = vsel %vm174_vm0, %v1384_v25, 0.0  ;;  %v250_v29 = vsel %vm174_vm0, %v1387_v26, 0.0  ;;  %v1396_v30 = vld [vmem:[%s1318_s25 + $0x28] sm:$0xff]  ;;  %v1399_v31 = vld [vmem:[%s1318_s25 + $0x20] sm:$0xff]  ;;  %v1402_v32 = vld [vmem:[%s1318_s25 + $0xd8] sm:$0xff] }
  0x1d   : > { %v190_v33 = vsel %vm174_vm0, %v1396_v30, 0.0  ;;  %v187_v34 = vsel %vm174_vm0, %v1399_v31, 0.0  ;;  %v256_v35 = vsel %vm174_vm0, %v1402_v32, 0.0  ;;  %v1411_v36 = vld [vmem:[%s1318_s25 + $0xa8] sm:$0xff]  ;;  %v1414_v37 = vld [vmem:[%s1318_s25 + $0xa0] sm:$0xff]  ;;  %v1417_v38 = vld [vmem:[%s1318_s25 + $0x30] sm:$0xff] }
  0x1e   : > { %v238_v39 = vsel %vm174_vm0, %v1411_v36, 0.0  ;;  %v235_v40 = vsel %vm174_vm0, %v1414_v37, 0.0  ;;  %v193_v41 = vsel %vm174_vm0, %v1417_v38, 0.0  ;;  %v1426_v42 = vld [vmem:[%s1318_s25 + $0xb8] sm:$0xff]  ;;  %v1429_v43 = vld [vmem:[%s1318_s25 + $0xb0] sm:$0xff]  ;;  %v1444_v49 = vld [vmem:[%s1318_s25 + $0x8] sm:$0xff] }
  0x1f   : > { %v1432_v44 = vld [vmem:[%s1318_s25 + $0x38] sm:$0xff]  ;;  %v244_v45 = vsel %vm174_vm0, %v1426_v42, 0.0  ;;  %v241_v46 = vsel %vm174_vm0, %v1429_v43, 0.0  ;;  %v1441_v48 = vld [vmem:[%s1318_s25 + $0x10] sm:$0xff]  ;;  %v1447_v50 = vld [vmem:[%s1318_s25] sm:$0xff]  ;;  %v178_v52 = vsel %vm174_vm0, %v1444_v49, 0.0 }
  0x20   : > { %v196_v47 = vsel %vm174_vm0, %v1432_v44, 0.0  ;;  %v181_v51 = vsel %vm174_vm0, %v1441_v48, 0.0  ;;  %v175_v53 = vsel %vm174_vm0, %v1447_v50, 0.0  ;;  %v1456_v54 = vld [vmem:[%s1318_s25 + $0x18] sm:$0xff]  ;;  %v1459_v55 = vld [vmem:[%s1318_s25 + $0x88] sm:$0xff]  ;;  %v1462_v56 = vld [vmem:[%s1318_s25 + $0x80] sm:$0xff] }
  0x21   : > { %221 = vadd.xlane.f32.xlu2 %v220_v9  ;;  %260 = vadd.xlane.f32.xlu1 %v259_v10  ;;  %v184_v57 = vsel %vm174_vm0, %v1456_v54, 0.0  ;;  %v226_v58 = vsel %vm174_vm0, %v1459_v55, 0.0  ;;  %v223_v59 = vsel %vm174_vm0, %v1462_v56, 0.0  ;;  %v1471_v60 = vld [vmem:[%s1318_s25 + $0x98] sm:$0xff]  ;;  %v1474_v61 = vld [vmem:[%s1318_s25 + $0x90] sm:$0xff]  ;;  %s1191_s25 = sshra.s32 %s1021_s13, 4  ;;  %s1192_s25 = int_to_ptr.hbm [resolvable:$true] %s1191_s25 }
  0x22   : > { %215 = vadd.xlane.f32.xlu0 %v214_v11  ;;  %v232_v62 = vsel %vm174_vm0, %v1471_v60, 0.0  ;;  %v229_v63 = vsel %vm174_vm0, %v1474_v61, 0.0  ;;  %s1193_s26 = scalar_lea.hbm %s1192_s25, 8  ;;  %p1198_p0 = scmp.lt.s32.totalorder %s1192_s25, %s1703_s2 }
  0x23   : > { %p1194_p11 = scmp.ne.s32.totalorder %s1192_s25, %s1193_s26 }
  0x25   : > { %p1195_p12 = pnand %p1194_p11, %p1303_p5 }
  0x27   : > { %p1196_p13 = pneg %p1195_p12 }
  0x29   : > { %269 = vadd.xlane.f32.xlu1 %v268_v15  ;;  %200 = vadd.xlane.f32.xlu2 %v199_v16 }
  0x2a   : > { %266 = vadd.xlane.f32.xlu0 %v265_v17 }
  0x31   : > { %206 = vadd.xlane.f32.xlu1 %v205_v21  ;;  %248 = vadd.xlane.f32.xlu2 %v247_v22 }
  0x32   : > { %203 = vadd.xlane.f32.xlu0 %v202_v23 }
  0x39   : > { %209 = vadd.xlane.f32.xlu1 %v208_v27  ;;  %254 = vadd.xlane.f32.xlu2 %v253_v28 }
  0x3a   : > { %251 = vadd.xlane.f32.xlu0 %v250_v29 }
  0x41   : > { %191 = vadd.xlane.f32.xlu2 %v190_v33  ;;  %188 = vadd.xlane.f32.xlu1 %v187_v34 }
  0x42   : > { %257 = vadd.xlane.f32.xlu0 %v256_v35 }
  0x49   : > { %239 = vadd.xlane.f32.xlu2 %v238_v39  ;;  %236 = vadd.xlane.f32.xlu1 %v235_v40 }
  0x4a   : > { %194 = vadd.xlane.f32.xlu0 %v193_v41 }
  0x51   : > { %245 = vadd.xlane.f32.xlu2 %v244_v45  ;;  %242 = vadd.xlane.f32.xlu1 %v241_v46 }
  0x52   : > { %197 = vadd.xlane.f32.xlu0 %v196_v47 }
  0x59   : > { %182 = vadd.xlane.f32.xlu2 %v181_v51  ;;  %179 = vadd.xlane.f32.xlu1 %v178_v52 }
  0x5a   : > { %176 = vadd.xlane.f32.xlu0 %v175_v53 }
  0x61   : > { %185 = vadd.xlane.f32.xlu2 %v184_v57  ;;  %227 = vadd.xlane.f32.xlu1 %v226_v58 }
  0x62   : > { %224 = vadd.xlane.f32.xlu0 %v223_v59 }
  0x69   : > { %233 = vadd.xlane.f32.xlu1 %v232_v62 }
  0x6a   : > { %230 = vadd.xlane.f32.xlu0 %v229_v63 }
  0x8c   : > { %v264_v3 = vpop.xlane.xlu2 %263  ;;  %v219_v4 = vpop.xlane.xlu1 %218 }
  0x8d   : > { %v213_v5 = vpop.xlane.xlu0 %212 }
  0x94   : > { %v222_v9 = vpop.xlane.xlu2 %221  ;;  %v261_v10 = vpop.xlane.xlu1 %260 }
  0x95   : > { %v216_v11 = vpop.xlane.xlu0 %215  ;;  %v334_v21 = vadd.f32 %v264_v3, %v261_v10 }
  0x96   : > { %v298_v15 = vadd.f32 %v216_v11, %v213_v5 }
  0x98   : > { %v299_v16 = vadd.f32 %v298_v15, %v219_v4 }
  0x9a   : > { %v300_v17 = vadd.f32 %v299_v16, %v222_v9 }
  0x9c   : > { %v301_v22 = vrot.slane %v300_v17, 4  ;;  %v270_v23 = vpop.xlane.xlu1 %269  ;;  %v201_v27 = vpop.xlane.xlu2 %200 }
  0x9d   : > { %v267_v28 = vpop.xlane.xlu0 %266 }
  0x9e   : > { %v302_v29 = vadd.f32 %v301_v22, %v300_v17  ;;  %v335_v33 = vadd.f32 %v334_v21, %v267_v28 }
  0xa0   : > { %v303_v34 = vrot.slane %v302_v29, 2  ;;  %v336_v35 = vadd.f32 %v335_v33, %v270_v23 }
  0xa2   : > { %v304_v39 = vadd.f32 %v303_v34, %v302_v29  ;;  %v337_v40 = vrot.slane %v336_v35, 4 }
  0xa4   : > { %v305_v41 = vrot.slane %v304_v39, 1  ;;  %v338_v45 = vadd.f32 %v337_v40, %v336_v35  ;;  %v207_v46 = vpop.xlane.xlu1 %206  ;;  %v249_v47 = vpop.xlane.xlu2 %248 }
  0xa5   : > { %v204_v51 = vpop.xlane.xlu0 %203 }
  0xa6   : > { %v339_v52 = vrot.slane %v338_v45, 2  ;;  %v306_v53 = vadd.f32 %v305_v41, %v304_v39  ;;  %v289_v57 = vadd.f32 %v204_v51, %v201_v27 }
  0xa8   : > { %v340_v58 = vadd.f32 %v339_v52, %v338_v45  ;;  %v346_v59 = vmul.f32 0.00390625, %v306_v53  ;;  %v290_v3 = vadd.f32 %v289_v57, %v207_v46 }
  0xaa   : > { %v341_v62 = vrot.slane %v340_v58, 1  ;;  %v366_v63 = vsub.f32 %v1336_v6, %v346_v59  ;;  %v365_v16 = vsub.f32 %v1324_v1, %v346_v59  ;;  %v364_v6 = vsub.f32 %v1342_v8, %v346_v59 }
  0xac   : > { %v342_v4 = vadd.f32 %v341_v62, %v340_v58  ;;  %1087 = vmatpush.xpose.msk.msra.mxu0 %vm174_vm0, %v366_v63  ;;  %v210_v5 = vpop.xlane.xlu1 %209  ;;  %v255_v9 = vpop.xlane.xlu2 %254 }
  0xad   : > { %v291_v10 = vadd.f32 %v290_v3, %v210_v5  ;;  %v252_v11 = vpop.xlane.xlu0 %251 }
  0xae   : > { %v350_v15 = vmul.f32 0.00390625, %v342_v4  ;;  %v325_v21 = vadd.f32 %v252_v11, %v249_v47 }
  0xaf   : > { %v292_v17 = vrot.slane %v291_v10, 4 }
  0xb0   : > { %1088 = vmatpush.xpose.msk.msra.mxu0 %vm174_vm0, %v365_v16  ;;  %v382_v22 = vsub.f32 %v1351_v12, %v350_v15  ;;  %v326_v28 = vadd.f32 %v325_v21, %v255_v9  ;;  %v381_v34 = vsub.f32 %v1357_v14, %v350_v15  ;;  %v363_v12 = vsub.f32 %v1327_v2, %v346_v59 }
  0xb1   : > { %v293_v23 = vadd.f32 %v292_v17, %v291_v10  ;;  %v380_v8 = vsub.f32 %v1321_v0, %v350_v15  ;;  %v379_v53 = vsub.f32 %v1339_v7, %v350_v15 }
  0xb2   : > { %1104 = vmatpush.xpose.msk.msra.mxu1 %vm174_vm0, %v382_v22 }
  0xb3   : > { %v294_v27 = vrot.slane %v293_v23, 2 }
  0xb4   : > { %1089 = vmatpush.xpose.msk.msra.mxu0 %vm174_vm0, %v364_v6  ;;  %v192_v29 = vpop.xlane.xlu2 %191  ;;  %v189_v33 = vpop.xlane.xlu1 %188 }
  0xb5   : > { %v295_v1 = vadd.f32 %v294_v27, %v293_v23  ;;  %v258_v35 = vpop.xlane.xlu0 %257  ;;  %v280_v63 = vadd.f32 %v192_v29, %v189_v33 }
  0xb6   : > { %v327_v39 = vadd.f32 %v326_v28, %v258_v35  ;;  %1105 = vmatpush.xpose.msk.msra.mxu1 %vm174_vm0, %v381_v34 }
  0xb7   : > { %v296_v40 = vrot.slane %v295_v1, 1 }
  0xb8   : > { %v328_v41 = vrot.slane %v327_v39, 4  ;;  %1090 = vmatpush.xpose.msk.msra.mxu0 %vm174_vm0, %v363_v12 }
  0xb9   : > { %v297_v45 = vadd.f32 %v296_v40, %v295_v1 }
  0xba   : > { %v329_v46 = vadd.f32 %v328_v41, %v327_v39  ;;  %1106 = vmatpush.xpose.msk.msra.mxu1 %vm174_vm0, %v380_v8 }
  0xbb   : > { %v345_v47 = vmul.f32 0.00390625, %v297_v45 }
  0xbc   : > { %v330_v51 = vrot.slane %v329_v46, 2  ;;  %v240_v14 = vpop.xlane.xlu2 %239  ;;  %v237_v52 = vpop.xlane.xlu1 %236 }
  0xbd   : > { %v195_v57 = vpop.xlane.xlu0 %194  ;;  %v362_v58 = vsub.f32 %v1381_v24, %v345_v47  ;;  %v361_v0 = vsub.f32 %v1366_v18, %v345_v47  ;;  %v316_v3 = vadd.f32 %v240_v14, %v237_v52  ;;  %v360_v24 = vsub.f32 %v1372_v20, %v345_v47 }
  0xbe   : > { %v331_v2 = vadd.f32 %v330_v51, %v329_v46  ;;  %1107 = vmatpush.xpose.msk.msra.mxu1 %vm174_vm0, %v379_v53  ;;  %v281_v5 = vadd.f32 %v280_v63, %v195_v57  ;;  %v359_v22 = vsub.f32 %v1354_v13, %v345_v47 }
  0xbf   : > { %1091 = vmatpush.xpose.msk.msra.mxu0 %vm174_vm0, %v362_v58 }
  0xc0   : > { %v332_v59 = vrot.slane %v331_v2, 1 }
  0xc2   : > { %v333_v62 = vadd.f32 %v332_v59, %v331_v2 }
  0xc3   : > { %1092 = vmatpush.xpose.msk.msra.mxu0 %vm174_vm0, %v361_v0 }
  0xc4   : > { %v349_v4 = vmul.f32 0.00390625, %v333_v62  ;;  %v246_v9 = vpop.xlane.xlu2 %245  ;;  %v243_v7 = vpop.xlane.xlu1 %242 }
  0xc5   : > { %v198_v10 = vpop.xlane.xlu0 %197  ;;  %v317_v11 = vadd.f32 %v316_v3, %v243_v7 }
  0xc6   : > { %v282_v15 = vadd.f32 %v281_v5, %v198_v10  ;;  %v378_v16 = vsub.f32 %v1402_v32, %v349_v4  ;;  %v377_v6 = vsub.f32 %v1384_v25, %v349_v4  ;;  %v376_v1 = vsub.f32 %v1387_v26, %v349_v4 }
  0xc7   : > { %v318_v17 = vadd.f32 %v317_v11, %v246_v9  ;;  %1093 = vmatpush.xpose.msk.msra.mxu0 %vm174_vm0, %v360_v24  ;;  %v375_v40 = vsub.f32 %v1369_v19, %v349_v4 }
  0xc8   : > { %v283_v18 = vrot.slane %v282_v15, 4  ;;  %1108 = vmatpush.xpose.msk.msra.mxu1 %vm174_vm0, %v378_v16 }
  0xc9   : > { %v319_v21 = vrot.slane %v318_v17, 4 }
  0xca   : > { %v284_v23 = vadd.f32 %v283_v18, %v282_v15 }
  0xcb   : > { %v320_v27 = vadd.f32 %v319_v21, %v318_v17  ;;  %1094 = vmatpush.xpose.msk.msra.mxu0 %vm174_vm0, %v359_v22 }
  0xcc   : > { %v285_v28 = vrot.slane %v284_v23, 2  ;;  %1109 = vmatpush.xpose.msk.msra.mxu1 %vm174_vm0, %v377_v6  ;;  %v183_v20 = vpop.xlane.xlu2 %182  ;;  %v180_v32 = vpop.xlane.xlu1 %179 }
  0xcd   : > { %v321_v29 = vrot.slane %v320_v27, 2  ;;  %v177_v33 = vpop.xlane.xlu0 %176 }
  0xce   : > { %v286_v34 = vadd.f32 %v285_v28, %v284_v23  ;;  %v271_v39 = vadd.f32 %v180_v32, %v177_v33  ;;  %v1248_v28 = vmov 1983009808  }
  0xcf   : > { %v322_v35 = vadd.f32 %v321_v29, %v320_v27 }
  0xd0   : > { %v287_v12 = vrot.slane %v286_v34, 1  ;;  %1110 = vmatpush.xpose.msk.msra.mxu1 %vm174_vm0, %v376_v1  ;;  %v272_v8 = vadd.f32 %v271_v39, %v183_v20  ;;  %v571_v20 = vunpack.c.l.s4 %v1248_v28 }
  0xd1   : > { %v323_v13 = vrot.slane %v322_v35, 1 }
  0xd2   : > { %v288_v25 = vadd.f32 %v287_v12, %v286_v34  ;;  %v1564_v34 = vunpack.c.0.s8 %v571_v20 }
  0xd3   : > { %v324_v41 = vadd.f32 %v323_v13, %v322_v35 }
  0xd4   : > { %v344_v45 = vmul.f32 0.00390625, %v288_v25  ;;  %1111 = vmatpush.xpose.msk.msra.mxu1 %vm174_vm0, %v375_v40  ;;  %v186_v46 = vpop.xlane.xlu2 %185  ;;  %v228_v47 = vpop.xlane.xlu1 %227 }
  0xd5   : > { %v348_v51 = vmul.f32 0.00390625, %v324_v41  ;;  %v273_v14 = vadd.f32 %v272_v8, %v186_v46  ;;  %v225_v52 = vpop.xlane.xlu0 %224  ;;  %v1249_v41 = vmov 1934713408  }
  0xd6   : > { %v358_v26 = vsub.f32 %v1432_v44, %v344_v45  ;;  %v357_v19 = vsub.f32 %v1417_v38, %v344_v45  ;;  %v307_v0 = vadd.f32 %v228_v47, %v225_v52  ;;  %v355_v7 = vsub.f32 %v1399_v31, %v344_v45 }
  0xd7   : > { %v274_v53 = vrot.slane %v273_v14, 4  ;;  %v374_v57 = vsub.f32 %v1426_v42, %v348_v51  ;;  %v373_v59 = vsub.f32 %v1429_v43, %v348_v51  ;;  %v356_v42 = vsub.f32 %v1396_v30, %v344_v45 }
  0xd8   : > { %1095 = vmatpush.xpose.msk.msra.mxu0 %vm174_vm0, %v358_v26  ;;  %v372_v5 = vsub.f32 %v1411_v36, %v348_v51  ;;  %v371_v11 = vsub.f32 %v1414_v37, %v348_v51  ;;  %v597_v8 = vunpack.c.l.s4 %v1249_v41 }
  0xd9   : > { %v275_v58 = vadd.f32 %v274_v53, %v273_v14  ;;  %1112 = vmatpush.xpose.msk.msra.mxu1 %vm174_vm0, %v374_v57 }
  0xda   : > { %v1571_v26 = vunpack.c.0.s8 %v597_v8 }
  0xdb   : > { %v276_v2 = vrot.slane %v275_v58, 2 }
  0xdc   : > { %1096 = vmatpush.xpose.msk.msra.mxu0 %vm174_vm0, %v357_v19  ;;  %v234_v44 = vpop.xlane.xlu1 %233 }
  0xdd   : > { %v277_v62 = vadd.f32 %v276_v2, %v275_v58  ;;  %v231_v63 = vpop.xlane.xlu0 %230  ;;  %1113 = vmatpush.xpose.msk.msra.mxu1 %vm174_vm0, %v373_v59 }
  0xde   : > { %v308_v3 = vadd.f32 %v307_v0, %v231_v63 }
  0xdf   : > { %v278_v4 = vrot.slane %v277_v62, 1 }
  0xe0   : > { %v309_v9 = vadd.f32 %v308_v3, %v234_v44  ;;  %1097 = vmatpush.xpose.msk.msra.mxu0 %vm174_vm0, %v356_v42 }
  0xe1   : > { %v279_v38 = vadd.f32 %v278_v4, %v277_v62  ;;  %1114 = vmatpush.xpose.msk.msra.mxu1 %vm174_vm0, %v372_v5 }
  0xe2   : > { %v310_v43 = vrot.slane %v309_v9, 4 }
  0xe3   : > { %v343_v10 = vmul.f32 0.00390625, %v279_v38 }
  0xe4   : > { %v311_v24 = vadd.f32 %v310_v43, %v309_v9  ;;  %1098 = vmatpush.xpose.msk.msra.mxu0 %vm174_vm0, %v355_v7 }
  0xe5   : > { %1115 = vmatpush.xpose.msk.msra.mxu1 %vm174_vm0, %v371_v11  ;;  %v354_v30 = vsub.f32 %v1456_v54, %v343_v10  ;;  %v353_v17 = vsub.f32 %v1441_v48, %v343_v10  ;;  %v352_v37 = vsub.f32 %v1444_v49, %v343_v10  ;;  %v351_v54 = vsub.f32 %v1447_v50, %v343_v10  ;;  %v383_v48 = vld [vmem:[%s1702_s1] sm:$0xf] }
  0xe6   : > { %v312_v36 = vrot.slane %v311_v24, 2 }
  0xe8   : > { %v313_v15 = vadd.f32 %v312_v36, %v311_v24  ;;  %1099 = vmatpush.xpose.msk.msra.mxu0 %vm174_vm0, %v354_v30 }
  0xea   : > { %v314_v16 = vrot.slane %v313_v15, 1 }
  0xec   : > { %v315_v18 = vadd.f32 %v314_v16, %v313_v15  ;;  %1100 = vmatpush.xpose.msk.msra.mxu0 %vm174_vm0, %v353_v17 }
  0xee   : > { %v347_v31 = vmul.f32 0.00390625, %v315_v18 }
  0xf0   : > { %1101 = vmatpush.xpose.msk.msra.mxu0 %vm174_vm0, %v352_v37  ;;  %v370_v21 = vsub.f32 %v1471_v60, %v347_v31  ;;  %v369_v22 = vsub.f32 %v1474_v61, %v347_v31  ;;  %v368_v49 = vsub.f32 %v1459_v55, %v347_v31  ;;  %v367_v60 = vsub.f32 %v1462_v56, %v347_v31 }
  0xf2   : > { %1116 = vmatpush.xpose.msk.msra.mxu1 %vm174_vm0, %v370_v21 }
  0xf4   : > { %1102 = vmatpush.xpose.msk.msra.mxu0 %vm174_vm0, %v351_v54 }
  0xf6   : > { %1117 = vmatpush.xpose.msk.msra.mxu1 %vm174_vm0, %v369_v22 }
  0xf7   : > { %1103 = vmatmul.msk.f32.vlgmr.msra.gmra.mxu0 %vm174_vm0, %v383_v48 }
  0xfa   : > { %1118 = vmatpush.xpose.msk.msra.mxu1 %vm174_vm0, %v368_v49 }
  0xfe   : > { %1119 = vmatpush.xpose.msk.msra.mxu1 %vm174_vm0, %v367_v60 }
 0x101   : > { %1120 = vmatmul.msk.f32.vlgmr.msra.gmra.mxu1 %vm174_vm0, %v383_v48 }
 0x174   : > { %v500_v50 = vpop.f32.mrf.mxu0 }
 0x175   : > { %530 = vrot.lane.b32.xlu1 %v500_v50, %s1241_s28  ;;  %527 = vrot.lane.b32.xlu0 %v500_v50, %s1242_s29 }
 0x176   : > { %524 = vrot.lane.b32.xlu2 %v500_v50, %s1243_s30 }
 0x17d   : > { %536 = vrot.lane.b32.xlu0 %v500_v50, %s1244_s3 }
 0x17e   : > { %533 = vrot.lane.b32.xlu2 %v500_v50, %s1245_s4  ;;  %v520_v55 = vpop.f32.mrf.mxu1 }
 0x17f   : > { %549 = vrot.lane.b32.xlu1 %v520_v55, %s1242_s29 }
 0x185   : > { %542 = vrot.lane.b32.xlu0 %v500_v50, %s1246_s5 }
 0x186   : > { %539 = vrot.lane.b32.xlu2 %v500_v50, %s1247_s6 }
 0x187   : > { %561 = vrot.lane.b32.xlu1 %v520_v55, %s1247_s6 }
 0x18d   : > { %546 = vrot.lane.b32.xlu0 %v520_v55, %s1243_s30 }
 0x18e   : > { %552 = vrot.lane.b32.xlu2 %v520_v55, %s1241_s28 }
 0x18f   : > { %564 = vrot.lane.b32.xlu1 %v520_v55, %s1246_s5 }
 0x195   : > { %558 = vrot.lane.b32.xlu0 %v520_v55, %s1244_s3 }
 0x196   : > { %555 = vrot.lane.b32.xlu2 %v520_v55, %s1245_s4 }
 0x1d0   : > { %v525_v56 = vpop.permute.xlu2 %524 }
 0x1d8   : > { %v534_v61 = vpop.permute.xlu2 %533 }
 0x1e0   : > { %v540_v32 = vpop.permute.xlu2 %539 }
 0x1e1   : > { %v580_v35 = vrot.slane %v540_v32, 4 }
 0x1e3   : > { %v581_v25 = vsel %vm568_vm1, %v580_v35, %v534_v61 }
 0x1e4   : > { %v585_v46 = vperm.slane %v581_v25, %v1564_v34 }
 0x1e6   : > { %v606_v19 = vrot.slane %v585_v46, 4 }
 0x1e7   : > { %v531_v23 = vpop.permute.xlu1 %530  ;;  %v528_v6 = vpop.permute.xlu0 %527 }
 0x1e8   : > { %v574_v27 = vrot.slane %v531_v23, 4  ;;  %v567_v29 = vrot.slane %v528_v6, 4  ;;  %v553_v47 = vpop.permute.xlu2 %552 }
 0x1e9   : > { %v630_v3 = vrot.slane %v553_v47, 4 }
 0x1ea   : > { %v575_v33 = vsel %vm568_vm1, %v574_v27, %v525_v56  ;;  %v569_v12 = vsel %vm568_vm1, %v567_v29, %v500_v50 }
 0x1eb   : > { %v579_v39 = vperm.slane %v575_v33, %v1564_v34  ;;  %v573_v40 = vperm.slane %v569_v12, %v1564_v34 }
 0x1ed   : > { %v592_v45 = vrot.slane %v579_v39, 4  ;;  %v594_v14 = vrot.slane %v573_v40, 4 }
 0x1ef   : > { %v537_v1 = vpop.permute.xlu0 %536  ;;  %v593_v57 = vsel %vm568_vm1, %v592_v45, %v573_v40  ;;  %v595_v59 = vsel %vm568_vm1, %v579_v39, %v594_v14 }
 0x1f0   : > { %v599_v0 = vperm.slane %v593_v57, %v1571_v26  ;;  %v603_v9 = vperm.slane %v595_v59, %v1571_v26  ;;  %v556_v24 = vpop.permute.xlu2 %555 }
 0x1f1   : > { %v550_v13 = vpop.permute.xlu1 %549 }
 0x1f2   : > { %v624_v62 = vrot.slane %v550_v13, 4  ;;  %v618_v11 = vrot.slane %v599_v0, 4  ;;  %v622_v40 = vrot.slane %v603_v9, 4 }
 0x1f4   : > { %v625_v30 = vsel %vm568_vm1, %v624_v62, %v520_v55 }
 0x1f5   : > { %v629_v54 = vperm.slane %v625_v30, %v1564_v34 }
 0x1f7   : > { %v543_v51 = vpop.permute.xlu0 %542  ;;  %v650_v55 = vrot.slane %v629_v54, 4 }
 0x1f8   : > { %v586_v52 = vrot.slane %v543_v51, 4 }
 0x1f9   : > { %v562_v53 = vpop.permute.xlu1 %561 }
 0x1fa   : > { %v587_v58 = vsel %vm568_vm1, %v586_v52, %v537_v1  ;;  %v636_v42 = vrot.slane %v562_v53, 4 }
 0x1fb   : > { %v591_v2 = vperm.slane %v587_v58, %v1564_v34 }
 0x1fc   : > { %v637_v15 = vsel %vm568_vm1, %v636_v42, %v556_v24 }
 0x1fd   : > { %v604_v63 = vrot.slane %v591_v2, 4  ;;  %v607_v44 = vsel %vm568_vm1, %v591_v2, %v606_v19  ;;  %v641_v22 = vperm.slane %v637_v15, %v1564_v34 }
 0x1fe   : > { %v615_v4 = vperm.slane %v607_v44, %v1571_v26 }
 0x1ff   : > { %v547_v5 = vpop.permute.xlu0 %546  ;;  %v605_v38 = vsel %vm568_vm1, %v604_v63, %v585_v46  ;;  %v662_v56 = vrot.slane %v641_v22, 4 }
 0x200   : > { %v631_v43 = vsel %vm568_vm1, %v630_v3, %v547_v5  ;;  %v620_v7 = vrot.slane %v615_v4, 4  ;;  %v611_v10 = vperm.slane %v605_v38, %v1571_v26  ;;  %v623_v41 = vsel %vm568_vm1, %v615_v4, %v622_v40 }
 0x201   : > { %v635_v36 = vperm.slane %v631_v43, %v1564_v34  ;;  %v565_v37 = vpop.permute.xlu1 %564 }
 0x202   : > { %v621_v16 = vsel %vm568_vm1, %v620_v7, %v603_v9  ;;  %v619_v17 = vsel %vm568_vm1, %v611_v10, %v618_v11  ;;  %v616_v18 = vrot.slane %v611_v10, 4  ;;  %v642_v48 = vrot.slane %v565_v37, 4 }
 0x203   : > { %v648_v31 = vrot.slane %v635_v36, 4  ;;  %744 = vxpose.xlu0.b32.start [1/2] (short) (narrow) %v621_v16, 16  ;;  %712 = vxpose.xlu1.b32.start [1/2] (short) (narrow) %v619_v17, 16  ;;  %v651_v28 = vsel %vm568_vm1, %v635_v36, %v650_v55 }
 0x204   : > { %v617_v21 = vsel %vm568_vm1, %v616_v18, %v599_v0  ;;  %v659_v29 = vperm.slane %v651_v28, %v1571_v26 }
 0x205   : > { %680 = vxpose.xlu2.b32.start [1/2] (short) (narrow) %v617_v21, 16  ;;  %v649_v60 = vsel %vm568_vm1, %v648_v31, %v629_v54 }
 0x206   : > { %v655_v23 = vperm.slane %v649_v60, %v1571_v26  ;;  %v678_v8 = vrot.slane %v659_v29, 4 }
 0x207   : > { %v559_v49 = vpop.permute.xlu0 %558 }
 0x208   : > { %v643_v50 = vsel %vm568_vm1, %v642_v48, %v559_v49  ;;  %v674_v35 = vrot.slane %v655_v23, 4 }
 0x209   : > { %v647_v61 = vperm.slane %v643_v50, %v1564_v34 }
 0x20b   : > { %v660_v6 = vrot.slane %v647_v61, 4  ;;  %v663_v27 = vsel %vm568_vm1, %v647_v61, %v662_v56 }
 0x20c   : > { %v671_v20 = vperm.slane %v663_v27, %v1571_v26 }
 0x20d   : > { %v661_v32 = vsel %vm568_vm1, %v660_v6, %v641_v22 }
 0x20e   : > { %v676_v33 = vrot.slane %v671_v20, 4  ;;  %v667_v1 = vperm.slane %v661_v32, %v1571_v26  ;;  %v679_v45 = vsel %vm568_vm1, %v671_v20, %v678_v8 }
 0x210   : > { %v677_v39 = vsel %vm568_vm1, %v676_v33, %v659_v29  ;;  %v675_v12 = vsel %vm568_vm1, %v667_v1, %v674_v35  ;;  %v672_v13 = vrot.slane %v667_v1, 4 }
 0x211   : > { %745 = vxpose.xlu0.b32.end [2/2] (short) (narrow) %v677_v39, 16  ;;  %713 = vxpose.xlu1.b32.end [2/2] (short) (narrow) %v675_v12, 16 }
 0x212   : > { %v673_v25 = vsel %vm568_vm1, %v672_v13, %v655_v23 }
 0x213   : > { %681 = vxpose.xlu2.b32.end [2/2] (short) (narrow) %v673_v25, 16 }
 0x219   : > { %776 = vxpose.xlu0.b32.start [1/2] (short) (narrow) %v623_v41, 16 }
 0x221   : > { %777 = vxpose.xlu0.b32.end [2/2] (short) (narrow) %v679_v45, 16 }
 0x2a4   : > { %v696_v47 = vpop.trf.xlu2 }
 0x2a5   : > { %v810_v0 = vrot.slane %v696_v47, 4 }
 0x2ac   : > { %v697_v53 = vpop.trf.xlu2 }
 0x2ad   : > { %v760_v46 = vpop.trf.xlu0  ;;  %v728_v14 = vpop.trf.xlu1  ;;  %v866_v19 = vrot.slane %v697_v53, 4 }
 0x2ae   : > { %v808_v52 = vrot.slane %v760_v46, 4  ;;  %v822_v58 = vrot.slane %v728_v14, 4  ;;  %v811_v38 = vsel %vm568_vm1, %v760_v46, %v810_v0 }
 0x2af   : > { %v819_v15 = vperm.slane %v811_v38, %v1564_v34 }
 0x2b0   : > { %v809_v57 = vsel %vm568_vm1, %v808_v52, %v696_v47 }
 0x2b1   : > { %v815_v2 = vperm.slane %v809_v57, %v1564_v34 }
 0x2b3   : > { %v834_v5 = vrot.slane %v815_v2, 4 }
 0x2b5   : > { %v761_v51 = vpop.trf.xlu0  ;;  %v729_v3 = vpop.trf.xlu1 }
 0x2b6   : > { %v867_v42 = vsel %vm568_vm1, %v761_v51, %v866_v19  ;;  %v878_v43 = vrot.slane %v729_v3, 4  ;;  %v864_v30 = vrot.slane %v761_v51, 4 }
 0x2b7   : > { %v875_v7 = vperm.slane %v867_v42, %v1564_v34 }
 0x2b8   : > { %v865_v48 = vsel %vm568_vm1, %v864_v30, %v697_v53 }
 0x2b9   : > { %v902_v21 = vrot.slane %v875_v7, 4  ;;  %v871_v6 = vperm.slane %v865_v48, %v1564_v34 }
 0x2bb   : > { %v890_v12 = vrot.slane %v871_v6, 4 }
 0x2bd   : > { %v792_v59 = vpop.trf.xlu0 }
 0x2be   : > { %v820_v62 = vrot.slane %v792_v59, 4  ;;  %v823_v63 = vsel %vm568_vm1, %v792_v59, %v822_v58 }
 0x2bf   : > { %v831_v44 = vperm.slane %v823_v63, %v1564_v34 }
 0x2c0   : > { %v821_v4 = vsel %vm568_vm1, %v820_v62, %v728_v14 }
 0x2c1   : > { %v827_v9 = vperm.slane %v821_v4, %v1564_v34  ;;  %v844_v11 = vrot.slane %v831_v44, 4 }
 0x2c3   : > { %v832_v10 = vrot.slane %v827_v9, 4  ;;  %v835_v24 = vsel %vm568_vm1, %v827_v9, %v834_v5  ;;  %v845_v22 = vsel %vm568_vm1, %v844_v11, %v819_v15 }
 0x2c4   : > { %v843_v36 = vperm.slane %v835_v24, %v1571_v26  ;;  %v851_v23 = vperm.slane %v845_v22, %v1571_v26 }
 0x2c5   : > { %v793_v16 = vpop.trf.xlu0  ;;  %v833_v17 = vsel %vm568_vm1, %v832_v10, %v815_v2 }
 0x2c6   : > { %v876_v18 = vrot.slane %v793_v16, 4  ;;  %v879_v31 = vsel %vm568_vm1, %v793_v16, %v878_v43  ;;  %925 = vrot.lane.b32.xlu1 %v843_v36, %s1247_s6  ;;  %v1623_v37 = vperm.slane %v833_v17, %v1571_v26  ;;  %v860_v20 = vrot.slane %v851_v23, 4 }
 0x2c7   : > { %v887_v54 = vperm.slane %v879_v31, %v1564_v34  ;;  %v858_v33 = vrot.slane %v843_v36, 4 }
 0x2c8   : > { %v877_v49 = vsel %vm568_vm1, %v876_v18, %v729_v3  ;;  %v856_v60 = vrot.slane %v1623_v37, 4  ;;  %v861_v35 = vsel %vm568_vm1, 0.0, %v860_v20 }
 0x2c9   : > { %v883_v50 = vperm.slane %v877_v49, %v1564_v34  ;;  %v903_v55 = vsel %vm568_vm1, %v887_v54, %v902_v21  ;;  %v900_v1 = vrot.slane %v887_v54, 4  ;;  %v846_v34 = vrot.slane %v819_v15, 4 }
 0x2ca   : > { %v857_v56 = vsel %vm568_vm1, 0.0, %v856_v60  ;;  %v911_v61 = vperm.slane %v903_v55, %v1571_v26  ;;  %v859_v13 = vsel %vm568_vm1, 0.0, %v858_v33 }
 0x2cb   : > { %v888_v27 = vrot.slane %v883_v50, 4  ;;  %921 = vrot.lane.b32.xlu2 %v857_v56, %s1246_s5  ;;  %v901_v25 = vsel %vm568_vm1, %v900_v1, %v875_v7  ;;  %v847_v40 = vsel %vm568_vm1, %v831_v44, %v846_v34  ;;  %v891_v41 = vsel %vm568_vm1, %v883_v50, %v890_v12 }
 0x2cc   : > { %969 = vrot.lane.b32.xlu0 %v911_v61, %s1242_s29  ;;  %v907_v8 = vperm.slane %v901_v25, %v1571_v26  ;;  %v855_v45 = vperm.slane %v847_v40, %v1571_v26  ;;  %v899_v46 = vperm.slane %v891_v41, %v1571_v26  ;;  %v918_v51 = vrot.slane %v911_v61, 4 }
 0x2cd   : > { %v889_v28 = vsel %vm568_vm1, %v888_v27, %v871_v6 }
 0x2ce   : > { %933 = vrot.lane.b32.xlu1 %v851_v23, %s1245_s4  ;;  %v895_v32 = vperm.slane %v889_v28, %v1571_v26  ;;  %v914_v47 = vrot.slane %v899_v46, 4  ;;  %v919_v52 = vsel %vm568_vm1, 0.0, %v918_v51  ;;  %v916_v53 = vrot.slane %v907_v8, 4 }
 0x2cf   : > { %v862_v26 = vrot.slane %v855_v45, 4 }
 0x2d0   : > { %v912_v29 = vrot.slane %v895_v32, 4  ;;  %v915_v14 = vsel %vm568_vm1, 0.0, %v914_v47  ;;  %v917_v57 = vsel %vm568_vm1, 0.0, %v916_v53 }
 0x2d1   : > { %v863_v58 = vsel %vm568_vm1, 0.0, %v862_v26 }
 0x2d2   : > { %v913_v39 = vsel %vm568_vm1, 0.0, %v912_v29 }
 0x2d3   : > { %937 = vrot.lane.b32.xlu2 %v861_v35, %s1241_s28 }
 0x2d4   : > { %949 = vrot.lane.b32.xlu0 %v913_v39, %s1246_s5 }
 0x2d6   : > { %929 = vrot.lane.b32.xlu1 %v859_v13, %s1244_s3 }
 0x2db   : > { %961 = vrot.lane.b32.xlu2 %v907_v8, %s1245_s4 }
 0x2dc   : > { %941 = vrot.lane.b32.xlu0 %v855_v45, %s1242_s29  ;;  %s1197_s29 = scalar_lea.hbm %s1703_s2, 16 }
 0x2dd   : > { %p1199_p1 = scmp.lt.s32.totalorder %s1197_s29, %s1193_s26 }
 0x2de   : > { %953 = vrot.lane.b32.xlu1 %v899_v46, %s1247_s6 }
 0x2df   : > { %p1200_p2 = por %p1199_p1, %p1198_p0 }
 0x2e1   : > { %p1201_p3 = pnand %p1200_p2, %p1196_p13 }
 0x2e3   : > { %957 = vrot.lane.b32.xlu2 %v915_v14, %s1244_s3 }
 0x2e6   : > { %973 = vrot.lane.b32.xlu1 %v919_v52, %s1243_s30 }
 0x2eb   : > { %965 = vrot.lane.b32.xlu2 %v917_v57, %s1241_s28 }
 0x2f3   : > { %945 = vrot.lane.b32.xlu2 %v863_v58, %s1243_s30 }
 0x325   : > { %v922_v19 = vpop.permute.xlu2 %921 }
 0x326   : > { %v977_v4 = vsel %vm976_vm2, %v1623_v37, %v922_v19 }
 0x32d   : > { %v938_v2 = vpop.permute.xlu2 %937 }
 0x335   : > { %v962_v0 = vpop.permute.xlu2 %961 }
 0x338   : > { %v926_v59 = vpop.permute.xlu1 %925 }
 0x339   : > { %v979_v5 = vsel %vm978_vm3, %v977_v4, %v926_v59 }
 0x33d   : > { %v958_v44 = vpop.permute.xlu2 %957 }
 0x33e   : > { %v970_v63 = vpop.permute.xlu0 %969 }
 0x340   : > { %v934_v62 = vpop.permute.xlu1 %933 }
 0x345   : > { %v966_v9 = vpop.permute.xlu2 %965 }
 0x346   : > { %v950_v42 = vpop.permute.xlu0 %949 }
 0x347   : > { %v990_v38 = vsel %vm976_vm2, %v895_v32, %v950_v42 }
 0x348   : > { %v930_v3 = vpop.permute.xlu1 %929 }
 0x349   : > { %v981_v7 = vsel %vm980_vm4, %v979_v5, %v930_v3 }
 0x34a   : > { %v983_v30 = vsel %vm982_vm5, %v981_v7, %v934_v62 }
 0x34b   : > { %v985_v16 = vsel %vm984_vm6, %v983_v30, %v938_v2 }
 0x34d   : > { %v946_v21 = vpop.permute.xlu2 %945 }
 0x34e   : > { %v942_v36 = vpop.permute.xlu0 %941 }
 0x34f   : > { %v987_v17 = vsel %vm986_vm7, %v985_v16, %v942_v36 }
 0x350   : > { %v954_v43 = vpop.permute.xlu1 %953  ;;  %v989_v22 = vsel %vm988_vm8, %v987_v17, %v946_v21 }
 0x351   : > { %v991_v10 = vsel %vm978_vm3, %v990_v38, %v954_v43 }
 0x352   : > { %v992_v11 = vsel %vm980_vm4, %v991_v10, %v958_v44 }
 0x353   : > { %v993_v24 = vsel %vm982_vm5, %v992_v11, %v962_v0 }
 0x354   : > { %v994_v15 = vsel %vm984_vm6, %v993_v24, %v966_v9 }
 0x355   : > { %v995_v31 = vsel %vm986_vm7, %v994_v15, %v970_v63 }
 0x358   : > { %v974_v18 = vpop.permute.xlu1 %973 }
 0x359   : > { %v996_v37 = vsel %vm988_vm8, %v995_v31, %v974_v18 }
 0x35a   : > { %v999_v54 = vrot.slane %v996_v37, 4 }
 0x35c   : > { %v1001_v48 = vsel %vm1000_vm9, %v989_v22, %v999_v54 }
 0x35d   : > { %1003 = vst [vmem:[%s136_s22] sm:$0xff] %v1001_v48 }
 0x35e   : > { %1204 = shalt.err (!%p1201_p3)
}
 0x35f   : > { %1128 = dma.vmem_to_hbm [thread:$0]  (%p1303_p5), %s1019_s23, 128, %s1021_s13, %s1005_s24  }
 0x360 PF: > { %p1134_p4 = scmp.ge.s32.totalorder %s1239_s12, 2  ;;  %s1032_s4 = sand.u32 1, %s1227_s9  }
 0x361   : > { %s1033_s5 = scalar_lea.sflag [#allocation3], %s1032_s4 }
 0x362   : > { %p1131_p7 = pnand %p1134_p4, %p1307_p6 }
 0x364   : > { %p1132_p8 = pneg %p1131_p7 }
 0x366   : > { %1222 = dma.done.wait (%p1132_p8), %s1033_s5, 128  }
 0x367   : > { %1224 = vsyncadd (%p1132_p8), %s1033_s5, 4294967168  ;;  %p12_p9 = scmp.ge.s32.totalorder %s1290_s15, 4   ;;  %s1706_s9 = smov %s1231_s10 }
 0x368   : > { %s1707_s10 = smov %s1235_s11  ;;  %s1708_s11 = smov %s1301_s18 }
 0x369   : > { %s1709_s12 = smov %s1290_s15  ;;  %14 = sbr.rel (!%p12_p9) target bundleno = 3 (0x3), region = 63 }
 0x36e   :  { %1039 = vsyncpa [#allocation3], 1 }
 0x36f   :  { %1041 = vsyncpa [#allocation3 + $0x1], 1 }

</bundles_post_ra>
